<compile_context>
chip_gen: v7x
topology: tpu7x:2x2x1
jax: 0.10.0
libtpu: 0.0.40
codegen_flags: <defaults>
</compile_context>

<pallas_src>
import jax
import jax.numpy as jnp
from jax.experimental import pallas as pl
from jax.experimental.pallas import tpu as pltpu


def poly1_kernel(x_ref, o_ref):
    # Numerically stable -softplus(x) = -(max(x,0) + log(1 + exp(-|x|))).
    # Same value as the PyTorch expression -log(1 - (-exp(x))) for normal-range inputs,
    # but does not overflow to -inf for x >~ 88. Compute in f32 (v5e's VPU/EUP have no
    # bf16 path; the kernel is HBM-bound so the casts ride in slack VALU slots).
    # Plain log (not log1p) is used to stay on guaranteed-supported EUP lowerings; the
    # numerical difference is < 6e-8 absolute and only for |x| > ~16.
    x = x_ref[...].astype(jnp.float32)
    y = -(jnp.maximum(x, 0.0) + jnp.log(1.0 + jnp.exp(-jnp.abs(x))))
    o_ref[...] = y.astype(o_ref.dtype)


# ~4 MiB per block: 2 input + 2 output double buffers = 16 MiB resident.
_TARGET_BLOCK_BYTES = 4 * 1024 * 1024
# Explicit scoped-VMEM limit: > 4x block (v5e default is only 16 MiB), < v7x's 64 MiB physical.
_VMEM_LIMIT_BYTES = 32 * 1024 * 1024

_LANE_CANDIDATES = (1024, 512, 256, 128)

_GRID_SEMANTICS = None


def _grid_semantics():
    """Prefer CORE_PARALLEL so multi-TensorCore chips (v7x) shard the 1D grid across both
    cores (plain "parallel" does not change codegen there); fall back to "parallel" if the
    current chip / compiler rejects it. Probed once, result cached."""
    global _GRID_SEMANTICS
    if _GRID_SEMANTICS is not None:
        return _GRID_SEMANTICS
    sems = ("parallel",)
    try:
        cand = (pltpu.CORE_PARALLEL,)
        probe = pl.pallas_call(
            poly1_kernel,
            out_shape=jax.ShapeDtypeStruct((20, 128), jnp.float32),
            grid_spec=pltpu.PrefetchScalarGridSpec(
                num_scalar_prefetch=0,
                grid=(3,),  # odd grid + partial edge block: same features the real calls use
                in_specs=[pl.BlockSpec((8, 128), lambda i: (i, 0))],
                out_specs=pl.BlockSpec((8, 128), lambda i: (i, 0)),
            ),
            compiler_params=pltpu.CompilerParams(dimension_semantics=cand),
        )
        jax.block_until_ready(probe(jnp.zeros((20, 128), jnp.float32)))
        sems = cand
    except Exception:
        pass
    _GRID_SEMANTICS = sems
    return sems


def _neg_softplus_jnp(x):
    """Plain-JAX path for tiny inputs / ragged (<128 element) tails."""
    xf = x.astype(jnp.float32)
    y = -(jnp.maximum(xf, 0.0) + jnp.log(1.0 + jnp.exp(-jnp.abs(xf))))
    return y.astype(x.dtype)


def _run_kernel_2d(x2d):
    rows, lanes = x2d.shape
    itemsize = jnp.dtype(x2d.dtype).itemsize
    target_rows = max(8, _TARGET_BLOCK_BYTES // (lanes * itemsize))
    if rows <= target_rows:
        tile_rows = rows  # single block equal to the full array dims (always legal)
        grid = 1
    else:
        tile_rows = int(target_rows)  # multiple of 8 by construction (powers of two)
        # Partial edge block: OOB input reads feed garbage into exp/log (benign, no traps
        # on TPU); the corresponding output writes are dropped by Pallas. Do not "fix" by
        # padding — that costs a full extra HBM round trip.
        grid = pl.cdiv(rows, tile_rows)
    n_stream = rows * lanes
    return pl.pallas_call(
        poly1_kernel,
        out_shape=jax.ShapeDtypeStruct((rows, lanes), x2d.dtype),
        grid_spec=pltpu.PrefetchScalarGridSpec(
            num_scalar_prefetch=0,
            grid=(grid,),
            in_specs=[pl.BlockSpec((tile_rows, lanes), lambda i: (i, 0))],
            out_specs=pl.BlockSpec((tile_rows, lanes), lambda i: (i, 0)),
        ),
        compiler_params=pltpu.CompilerParams(
            dimension_semantics=_grid_semantics(),
            vmem_limit_bytes=_VMEM_LIMIT_BYTES,
        ),
        cost_estimate=pl.CostEstimate(
            flops=6 * n_stream,
            transcendentals=2 * n_stream,
            bytes_accessed=2 * n_stream * itemsize,
        ),
    )(x2d)


@jax.jit
def poly1(x):
    """y = -log(1 + exp(x)) elementwise (Poly1.forward) via a Pallas TPU kernel.

    Works for any shape; float dtypes. Returns same shape/dtype as input.
    """
    orig_shape = x.shape
    n = x.size
    if n == 0:
        return x
    x_flat = jnp.ravel(x)  # metadata-only for contiguous inputs under jit

    lanes = next((c for c in _LANE_CANDIDATES if n % c == 0), None)
    if lanes is not None:
        # Fast path: zero-copy reshape to a lane-dense 2D slab.
        out2d = _run_kernel_2d(x_flat.reshape(n // lanes, lanes))
        return out2d.reshape(orig_shape)

    # Irregular size: kernel over the 128-aligned bulk, tiny (<128 element) tail in plain
    # jnp. Avoids the full-array jnp.pad round trip of the previous version.
    bulk = (n // 128) * 128
    if bulk == 0:
        # Not worth a kernel launch for < 128 elements.
        return _neg_softplus_jnp(x_flat).reshape(orig_shape)
    lanes = next(c for c in _LANE_CANDIDATES if bulk % c == 0)
    bulk_out = _run_kernel_2d(x_flat[:bulk].reshape(bulk // lanes, lanes))
    tail_out = _neg_softplus_jnp(x_flat[bulk:])
    return jnp.concatenate([bulk_out.reshape(-1), tail_out]).reshape(orig_shape)


if __name__ == "__main__":
    key = jax.random.PRNGKey(0)
    # Small NCHW input consistent with a conv-style module: [B, C, H, W]
    x = jax.random.normal(key, (2, 4, 16, 16), dtype=jnp.float32)

    y = jax.block_until_ready(poly1(x))

    # Reference: the original PyTorch expression, in plain JAX.
    y_ref = -jnp.log(1.0 - (-jnp.exp(x)))
    assert y.shape == x.shape and y.dtype == x.dtype
    assert jnp.allclose(y, y_ref, atol=1e-5, rtol=1e-5)

    # Exercise the irregular-size (bulk + tail) path as well.
    x_odd = jax.random.normal(jax.random.PRNGKey(1), (3, 7, 13), dtype=jnp.float32)
    y_odd = jax.block_until_ready(poly1(x_odd))
    y_odd_ref = -jnp.log(1.0 - (-jnp.exp(x_odd)))
    assert jnp.allclose(y_odd, y_odd_ref, atol=1e-5, rtol=1e-5)

    print("KERNEL_OK")
</pallas_src>

<mosaic_0001>
module attributes {stable_mosaic.version = 11 : i64} {
  func.func @poly1_kernel(%arg0: i32, %arg1: memref<2x1024xf32, #tpu.memory_space<vmem>>, %arg2: memref<2x1024xf32, #tpu.memory_space<vmem>>) attributes {dimension_semantics = [#tpu.dimension_semantics<core_parallel>], iteration_bounds = array<i64: 1>, scalar_prefetch = 0 : i64, scratch_operands = 0 : i64, tpu.core_type = #tpu.core_type<tc>, window_params = [{transform_indices = @transform_0, window_bounds = array<i64: 2, 1024>}, {transform_indices = @transform_1, window_bounds = array<i64: 2, 1024>}]} {
    %c0 = arith.constant 0 : index
    %c0_0 = arith.constant 0 : index
    %0 = vector.load %arg1[%c0, %c0_0] : memref<2x1024xf32, #tpu.memory_space<vmem>>, vector<2x1024xf32>
    %cst = arith.constant 0.000000e+00 : f32
    %1 = vector.broadcast %cst : f32 to vector<2x1024xf32>
    %2 = arith.maximumf %0, %1 : vector<2x1024xf32>
    %3 = math.absf %0 : vector<2x1024xf32>
    %cst_1 = arith.constant 0.000000e+00 : f32
    %4 = vector.broadcast %cst_1 : f32 to vector<2x1024xf32>
    %5 = arith.subf %4, %3 : vector<2x1024xf32>
    %6 = math.exp %5 : vector<2x1024xf32>
    %cst_2 = arith.constant 1.000000e+00 : f32
    %7 = vector.broadcast %cst_2 : f32 to vector<2x1024xf32>
    %8 = arith.addf %7, %6 : vector<2x1024xf32>
    %9 = math.log %8 : vector<2x1024xf32>
    %10 = arith.addf %2, %9 : vector<2x1024xf32>
    %cst_3 = arith.constant 0.000000e+00 : f32
    %11 = vector.broadcast %cst_3 : f32 to vector<2x1024xf32>
    %12 = arith.subf %11, %10 : vector<2x1024xf32>
    %c0_4 = arith.constant 0 : index
    %c0_5 = arith.constant 0 : index
    %13 = vector.load %arg2[%c0_4, %c0_5] : memref<2x1024xf32, #tpu.memory_space<vmem>>, vector<2x1024xf32>
    tpu.vector_store %arg2[%c0_4, %c0_5], %12 {strides = array<i32>} : memref<2x1024xf32, #tpu.memory_space<vmem>>, vector<2x1024xf32>,
    return
  }
  func.func @transform_0(%arg0: i32) -> (i32, i32) {
    %c0_i32 = arith.constant 0 : i32
    %c0_i32_0 = arith.constant 0 : i32
    return %arg0, %c0_i32 : i32, i32
  }
  func.func @transform_1(%arg0: i32) -> (i32, i32) {
    %c0_i32 = arith.constant 0 : i32
    %c0_i32_0 = arith.constant 0 : i32
    return %arg0, %c0_i32 : i32, i32
  }
}

</mosaic_0001>

<bundles_post_ra>
// kernel: poly1.1
= control target key start
LH: loop header
LB: loop body
LE: loop exit
PB: predicated region body
PF: predicated region fallthrough
CT: control target
= control target key end

     0   :  { %s121_s0 = inlined_call_operand.vmem [shape: f32[2,1024], index: 0, kind: input, shape index: {}]   ;;  %s122_s1 = inlined_call_operand.vmem [shape: f32[2,1024], index: 1, kind: output, shape index: {}]  }
   0x1   :  { %v33_v0 = vld [vmem:[%s121_s0] sm:$0xff]  ;;  %v34_v1 = vld [vmem:[%s121_s0 + $0x8] sm:$0xff] }
   0x2   :  { %v37_v2 = vand.u32 2147483647, %v33_v0  ;;  %v38_v3 = vand.u32 2147483647, %v34_v1  ;;  %v35_v12 = vmax.f32 %v33_v0, 0.0  ;;  %v36_v14 = vmax.f32 %v34_v1, 0.0 }
   0x4   :  { %v39_v4 = vsub.f32 0.0, %v37_v2  ;;  %v40_v5 = vsub.f32 0.0, %v38_v3 }
   0x6   :  { %v41_v6 = vmul.f32 1.442695, %v39_v4  ;;  %v43_v7 = vmul.f32 1.442695, %v40_v5 }
   0x8   :  { %91 = vpow2.f32 %v41_v6 }
   0x9   :  { %93 = vpow2.f32 %v43_v7 }
  0x12   :  { %v92_v8 = vpop.eup %91 }
  0x13   :  { %v94_v9 = vpop.eup %93  ;;  %v45_v10 = vadd.f32 1.0, %v92_v8 }
  0x14   :  { %v46_v11 = vadd.f32 1.0, %v94_v9 }
  0x15   :  { %95 = vlog2.f32 %v45_v10 }
  0x16   :  { %97 = vlog2.f32 %v46_v11 }
  0x1f   :  { %v96_v13 = vpop.eup %95 }
  0x20   :  { %v98_v15 = vpop.eup %97  ;;  %v48_v16 = vmul.f32 0.6931472, %v96_v13 }
  0x21   :  { %v50_v17 = vmul.f32 0.6931472, %v98_v15 }
  0x22   :  { %v51_v18 = vadd.f32 %v48_v16, %v35_v12 }
  0x23   :  { %v52_v19 = vadd.f32 %v50_v17, %v36_v14 }
  0x24   :  { %v53_v20 = vsub.f32 0.0, %v51_v18 }
  0x25   :  { %v54_v21 = vsub.f32 0.0, %v52_v19 }
  0x26   :  { %55 = vst [vmem:[%s122_s1] sm:$0xff] %v53_v20 }
  0x27   :  { %56 = vst [vmem:[%s122_s1 + $0x8] sm:$0xff] %v54_v21 }

</bundles_post_ra>
